<compile_context>
chip_gen: v7x
topology: tpu7x:2x2x1
jax: 0.10.0
libtpu: 0.0.40
codegen_flags: <defaults>
</compile_context>

<pallas_src>
import jax
import jax.numpy as jnp
from jax.experimental import pallas as pl
from jax.experimental.pallas import tpu as pltpu


def _embedding_net_kernel(inputs_ref, emb_ref, out_ref):
    # inputs_ref: [1, R, S+1] (one example), emb_ref: [V, D], out_ref: [1, 1, D]
    x = inputs_ref[0]                               # [R, S+1] float32
    emb = emb_ref[...]                              # [V, D]   float32

    R = x.shape[0]
    S = x.shape[1] - 1
    V = emb.shape[0]
    inv_s = jnp.float32(1.0 / S)

    # In-kernel split of the packed input: col 0 = ratio, cols 1.. = token ids.
    # astype(int32) truncates toward zero, matching torch Tensor.int().
    ratio = x[:, 0:1]                               # [R, 1]
    ids = x[:, 1:].astype(jnp.int32)                # [R, S]

    # One-hot with V on the lane axis from the start: [R, S, V].
    vocab_iota = jax.lax.broadcasted_iota(jnp.int32, (R, S, V), 2)
    onehot = (ids[:, :, None] == vocab_iota).astype(jnp.float32)
    # Fold the ratio/S weighting in before reduction (VPU broadcast, no relayout).
    weighted = onehot * (ratio * inv_s)[:, :, None]                     # [R, S, V]

    # Collapse only the leading (R, S) dims (layout-preserving; V stays on
    # lanes), then one MXU contraction with a ones LHS:
    #   vocab_w[1, V] = ones[1, R*S] @ weighted[R*S, V]
    weighted2d = weighted.reshape(R * S, V)                             # [R*S, V]
    ones_lhs = jnp.ones((1, R * S), jnp.float32)
    vocab_w = jnp.dot(ones_lhs, weighted2d,
                      preferred_element_type=jnp.float32)               # [1, V]

    # Weighted sum of embedding rows.
    out = jnp.dot(vocab_w, emb, preferred_element_type=jnp.float32)     # [1, D]
    out_ref[...] = out.reshape(out_ref.shape)                           # [1, 1, D]


def embedding_network_forward_batched(inputs_b, emb_table):
    """Batched forward.

    inputs_b: [B, 7, S+1] float32 (col 0 = ratio, cols 1.. = token ids)
    emb_table: [V, D] float32
    Returns [B, 1, D] float32 (one [1, D] module output per example).
    """
    B, R, Sp1 = inputs_b.shape
    V, D = emb_table.shape
    return pl.pallas_call(
        _embedding_net_kernel,
        out_shape=jax.ShapeDtypeStruct((B, 1, D), jnp.float32),
        grid=(B,),
        in_specs=[
            # One example per grid step.
            pl.BlockSpec((1, R, Sp1), lambda b: (b, 0, 0)),
            # Same block index every step -> table DMA'd once, stays VMEM-resident.
            pl.BlockSpec((V, D), lambda b: (0, 0)),
        ],
        out_specs=pl.BlockSpec((1, 1, D), lambda b: (b, 0, 0)),
        compiler_params=pltpu.CompilerParams(
            dimension_semantics=("parallel",)),   # shard batch across TCs on v7x
    )(inputs_b, emb_table)


def embedding_network_forward(inputs, emb_table):
    """Single-example forward matching the PyTorch module: [7, S+1] -> [1, D]."""
    return embedding_network_forward_batched(inputs[None], emb_table)[0]


if __name__ == "__main__":
    # Shapes implied by the module's forward contract: inputs is [7, max_seq_len+1].
    R = 7                    # fixed by the module (7 rows)
    max_seq_len = 8
    vocab_size = 64
    embedding_dim = 32
    batch = 4                # batched variant: B examples in one pallas_call

    key = jax.random.PRNGKey(0)
    k_emb, k_ids, k_ratio = jax.random.split(key, 3)

    # Deterministic "pretrained" embedding weights (role of nn.Embedding init).
    emb_table = jax.random.normal(k_emb, (vocab_size, embedding_dim), jnp.float32)

    ids = jax.random.randint(
        k_ids, (batch, R, max_seq_len), 0, vocab_size).astype(jnp.float32)
    ratio = jax.random.uniform(k_ratio, (batch, R, 1), jnp.float32)
    inputs_b = jnp.concatenate([ratio, ids], axis=2)        # [B, 7, max_seq_len+1]

    # Batched kernel call (B examples, one grid).
    out_b = jax.block_until_ready(
        embedding_network_forward_batched(inputs_b, emb_table))
    # Single-example path (exact module signature).
    out_1 = jax.block_until_ready(
        embedding_network_forward(inputs_b[0], emb_table))

    # Plain-JAX reference of the exact PyTorch forward semantics.
    ids_i = inputs_b[:, :, 1:].astype(jnp.int32)             # [B, R, S]
    means = jnp.mean(emb_table[ids_i], axis=2)               # [B, R, D]
    ref_b = jnp.einsum('br,brd->bd',
                       inputs_b[:, :, 0], means)[:, None, :]  # [B, 1, D]

    assert out_b.shape == (batch, 1, embedding_dim)
    assert out_1.shape == (1, embedding_dim)
    assert jnp.allclose(out_b, ref_b, atol=1e-5, rtol=1e-5)
    assert jnp.allclose(out_1, ref_b[0], atol=1e-5, rtol=1e-5)
    print("KERNEL_OK")
</pallas_src>

<mosaic_0001>
module attributes {stable_mosaic.version = 11 : i64} {
  func.func @_embedding_net_kernel(%arg0: i32, %arg1: memref<1x7x9xf32, #tpu.memory_space<vmem>>, %arg2: memref<64x32xf32, #tpu.memory_space<vmem>>, %arg3: memref<1x1x32xf32, #tpu.memory_space<vmem>>) attributes {dimension_semantics = [#tpu.dimension_semantics<parallel>], iteration_bounds = array<i64: 4>, scalar_prefetch = 0 : i64, scratch_operands = 0 : i64, tpu.core_type = #tpu.core_type<tc>, window_params = [{transform_indices = @transform_0, window_bounds = array<i64: 1, 7, 9>}, {pipeline_mode = #tpu.pipeline_mode<synchronous>, transform_indices = @transform_1, window_bounds = array<i64: 64, 32>}, {transform_indices = @transform_2, window_bounds = array<i64: 1, 1, 32>}]} {
    %c0 = arith.constant 0 : index
    %c0_0 = arith.constant 0 : index
    %c0_1 = arith.constant 0 : index
    %0 = vector.load %arg1[%c0, %c0_0, %c0_1] : memref<1x7x9xf32, #tpu.memory_space<vmem>>, vector<1x7x9xf32>
    %1 = vector.shape_cast %0 : vector<1x7x9xf32> to vector<7x9xf32>
    %c0_2 = arith.constant 0 : index
    %c0_3 = arith.constant 0 : index
    %2 = vector.load %arg2[%c0_2, %c0_3] : memref<64x32xf32, #tpu.memory_space<vmem>>, vector<64x32xf32>
    %3 = vector.extract_strided_slice %1 {offsets = [0, 0], sizes = [7, 1], strides = [1, 1]} : vector<7x9xf32> to vector<7x1xf32>
    %4 = vector.extract_strided_slice %1 {offsets = [0, 1], sizes = [7, 8], strides = [1, 1]} : vector<7x9xf32> to vector<7x8xf32>
    %5 = arith.fptosi %4 : vector<7x8xf32> to vector<7x8xi32>
    %6 = tpu.iota {dimensions = array<i32: 2>} : vector<7x8x64xi32>
    %7 = vector.shape_cast %5 : vector<7x8xi32> to vector<7x8x1xi32>
    %8 = vector.broadcast %7 : vector<7x8x1xi32> to vector<7x8x64xi32>
    %9 = arith.cmpi eq, %8, %6 : vector<7x8x64xi32>
    %10 = arith.extui %9 : vector<7x8x64xi1> to vector<7x8x64xi32>
    %11 = arith.sitofp %10 : vector<7x8x64xi32> to vector<7x8x64xf32>
    %cst = arith.constant 1.250000e-01 : f32
    %12 = vector.broadcast %cst : f32 to vector<7x1xf32>
    %13 = arith.mulf %3, %12 : vector<7x1xf32>
    %14 = vector.shape_cast %13 : vector<7x1xf32> to vector<7x1x1xf32>
    %15 = vector.broadcast %14 : vector<7x1x1xf32> to vector<7x8x64xf32>
    %16 = arith.mulf %11, %15 : vector<7x8x64xf32>
    %17 = vector.shape_cast %16 : vector<7x8x64xf32> to vector<56x64xf32>
    %cst_4 = arith.constant 1.000000e+00 : f32
    %18 = vector.broadcast %cst_4 : f32 to vector<1x56xf32>
    %cst_5 = arith.constant dense<0.000000e+00> : vector<1x64xf32>
    %19 = tpu.matmul %18, %17, %cst_5 {dimension_numbers = #tpu.dot_dimension_numbers<[1], [0], [0], [1], [0, 0, 1, 1], [], []>} : vector<1x56xf32>, vector<56x64xf32>, vector<1x64xf32> -> vector<1x64xf32>
    %cst_6 = arith.constant dense<0.000000e+00> : vector<1x32xf32>
    %20 = tpu.matmul %19, %2, %cst_6 {dimension_numbers = #tpu.dot_dimension_numbers<[1], [0], [0], [1], [0, 0, 1, 1], [], []>} : vector<1x64xf32>, vector<64x32xf32>, vector<1x32xf32> -> vector<1x32xf32>
    %21 = vector.shape_cast %20 : vector<1x32xf32> to vector<1x1x32xf32>
    %c0_7 = arith.constant 0 : index
    %c0_8 = arith.constant 0 : index
    %c0_9 = arith.constant 0 : index
    %22 = vector.load %arg3[%c0_7, %c0_8, %c0_9] : memref<1x1x32xf32, #tpu.memory_space<vmem>>, vector<1x1x32xf32>
    tpu.vector_store %arg3[%c0_7, %c0_8, %c0_9], %21 {strides = array<i32>} : memref<1x1x32xf32, #tpu.memory_space<vmem>>, vector<1x1x32xf32>,
    return
  }
  func.func @transform_0(%arg0: i32) -> (i32, i32, i32) {
    %c0_i32 = arith.constant 0 : i32
    %c0_i32_0 = arith.constant 0 : i32
    %c0_i32_1 = arith.constant 0 : i32
    return %arg0, %c0_i32, %c0_i32_0 : i32, i32, i32
  }
  func.func @transform_1(%arg0: i32) -> (i32, i32) {
    %c0_i32 = arith.constant 0 : i32
    %c0_i32_0 = arith.constant 0 : i32
    %c0_i32_1 = arith.constant 0 : i32
    return %c0_i32, %c0_i32_0 : i32, i32
  }
  func.func @transform_2(%arg0: i32) -> (i32, i32, i32) {
    %c0_i32 = arith.constant 0 : i32
    %c0_i32_0 = arith.constant 0 : i32
    %c0_i32_1 = arith.constant 0 : i32
    return %arg0, %c0_i32, %c0_i32_0 : i32, i32, i32
  }
}

</mosaic_0001>

<bundles_post_ra>
// kernel: tpu_custom_call.1
= control target key start
LH: loop header
LB: loop body
LE: loop exit
PB: predicated region body
PF: predicated region fallthrough
CT: control target
= control target key end

     0   :  { %7 = vsyncpa [#allocation3], 0  ;;  %s927_s0 = inlined_call_operand.vmem [shape: f32[4,7,9], index: 0, kind: input, shape index: {}]   ;;  %s928_s1 = inlined_call_operand.vmem [shape: f32[64,32], index: 1, kind: input, shape index: {}]   ;;  %s929_s2 = inlined_call_operand.hbm [shape: f32[4,1,32], index: 2, kind: output, shape index: {}]  }
   0x1   :  { %9 = vsyncpa [#allocation3 + $0x1], 0  ;;  %s784_s9 = smov 0   ;;  %s786_s10 = smov 0  }
   0x2   :  { %s788_s11 = smov 0   ;;  %s790_s12 = smov 0  }
   0x3 LB: > { %s805_s13 = sadd.s32 4294967295, %s760_s12   ;;  %s558_s14 = sadd.s32 4294967294, %s760_s12   ;;  %s760_s12 = sphi %s790_s12, %s935_s12   ;;  %s756_s11 = sphi %s788_s11, %s934_s11   ;;  %s752_s10 = sphi %s786_s10, %s933_s10   ;;  %s748_s9 = sphi %s784_s9, %s932_s9  }
   0x4   : > { %s809_s15 = sadd.s32 1, %s760_s12   ;;  %s69_s16 = sadd.s32 1, %s756_s11 }
   0x5   : > { %s66_s17 = ssub.s32 %s760_s12, %s809_s15  ;;  %p79_p0 = scmp.ne.s32.totalorder %s756_s11, %s752_s10 }
   0x6   : > { %p67_p1 = scmp.eq.s32.totalorder %s66_s17, 0  ;;  %p80_p2 = scmp.eq.s32.totalorder %s805_s13, 3 }
   0x7   : > { %p85_p3 = scmp.ne.s32.totalorder %s752_s10, %s748_s9  ;;  %p86_p4 = scmp.eq.s32.totalorder %s558_s14, 3 }
   0x8   : > { %s820_s18 = scalar_select %p67_p1, %s756_s11, %s69_s16  }
   0x9   : > { %p822_p5 = por %p80_p2, %p79_p0  ;;  %p826_p6 = por %p86_p4, %p85_p3 }
   0xa   : > { %p561_p7 = scmp.ge.s32.totalorder %s760_s12, 1  ;;  %p114_p8 = scmp.lt.s32.totalorder %s760_s12, 5 }
   0xc   : > { %p115_p9 = pnand %p561_p7, %p114_p8 }
   0xd   : > { %p134_p10 = scmp.lt.s32.totalorder (!%p115_p9), %s805_s13, 3  ;;  %v148_v0 = vlaneseq (!%p115_p9)  ;;  %v762_v1 = vmov (!%p115_p9), 0   ;;  %v763_v2 = vmov (!%p115_p9), 1966171168   ;;  %v764_v34 = vmov (!%p115_p9), 0.0|0.0   ;;  %v139_v46 = vld [vmem:[%s928_s1] sm:$0xff] (!%p115_p9) }
   0xe   : > { %118 = sbr.rel (%p115_p9) target bundleno = 629 (0x275), region = 28  ;;  %697 = vset.pattern.permute.xlu1 (!%p115_p9), %v762_v1  ;;  %696 = vset.pattern.permute.xlu0 (!%p115_p9), %v762_v1  ;;  %v231_v3 = vunpack.c.l.s4 (!%p115_p9), %v763_v2  ;;  %vm765_vm0 = vmmov (!%p115_p9), 0   ;;  %v766_v45 = vmov (!%p115_p9), 0.0   ;;  %v140_v47 = vld [vmem:[%s928_s1 + $0x8] sm:$0xff] (!%p115_p9)  ;;  %v141_v48 = vld [vmem:[%s928_s1 + $0x10] sm:$0xff] (!%p115_p9)  ;;  %v142_v50 = vld [vmem:[%s928_s1 + $0x18] sm:$0xff] (!%p115_p9) }
   0xf   : > { %v151_v4 = vshrl.u32 (!%p115_p9), %v148_v0, 7  ;;  %628 = vmatprep.subr.bf16.mxu0 (!%p115_p9), %v764_v34  ;;  %637 = vmatprep.subr.bf16.mxu1 (!%p115_p9), %v764_v34  ;;  %v638_v49 = vpack.c.bf16 (!%p115_p9), %v140_v47, %v139_v46  ;;  %v641_v51 = vpack.c.bf16 (!%p115_p9), %v142_v50, %v141_v48  ;;  %v143_v52 = vld [vmem:[%s928_s1 + $0x20] sm:$0xff] (!%p115_p9)  ;;  %v144_v53 = vld [vmem:[%s928_s1 + $0x28] sm:$0xff] (!%p115_p9)  ;;  %v145_v55 = vld [vmem:[%s928_s1 + $0x30] sm:$0xff] (!%p115_p9)  ;;  %v149_v60 = vand.u32 (!%p115_p9), 127, %v148_v0  ;;  %s132_s23 = sand.u32 (!%p115_p9), 1, %s752_s10  }
  0x10   : > { %v232_v5 = vunpack.c.0.s8 (!%p115_p9), %v231_v3  ;;  %606 = vmatprep.mubr.msk.f32.mxu0 (!%p115_p9), %vm765_vm0, %v766_v45  ;;  %625 = vmatprep.mubr.msk.f32.mxu1 (!%p115_p9), %vm765_vm0, %v766_v45  ;;  %v644_v54 = vpack.c.bf16 (!%p115_p9), %v144_v53, %v143_v52  ;;  %v146_v56 = vld [vmem:[%s928_s1 + $0x38] sm:$0xff] (!%p115_p9)  ;;  %vm340_vm8 = vcmask (!%p115_p9), 457728   ;;  %vm414_vm9 = vcmask (!%p115_p9), 523264   ;;  %s572_s24 = sshll.u32 (!%p115_p9), %s805_s13, 4  ;;  %s491_s30 = scalar_lea.sflag (!%p115_p9), [#allocation3], %s132_s23 }
  0x11   : > { %v160_v9 = vsub.s32 (!%p115_p9), 1, %v151_v4  ;;  %v152_v10 = vsub.s32 (!%p115_p9), 0, %v151_v4  ;;  %v168_v29 = vsub.s32 (!%p115_p9), 2, %v151_v4  ;;  %v176_v30 = vsub.s32 (!%p115_p9), 3, %v151_v4  ;;  %639 = vmatpush3.bf16.msra.mxu1 (!%p115_p9), %v638_v49  ;;  %s885_s29 = scalar_lea.hbm (!%p115_p9), %s929_s2, %s572_s24 }
  0x12   : > { %v235_v6 = vsub.s32 (!%p115_p9), %v232_v5, %v151_v4  ;;  %v184_v36 = vsub.s32 (!%p115_p9), 4, %v151_v4  ;;  %v192_v38 = vsub.s32 (!%p115_p9), 5, %v151_v4  ;;  %v200_v42 = vsub.s32 (!%p115_p9), 6, %v151_v4  ;;  %640 = vmatprep.subr.bf16.mxu1 (!%p115_p9), %v764_v34 }
  0x13   : > { %v647_v57 = vpack.c.bf16 (!%p115_p9), %v146_v56, %v145_v55  ;;  %vm488_vm10 = vcmask (!%p115_p9), 253952  }
  0x15   : > { %s135_s21 = scalar_select %p134_p10, %s805_s13, 3  ;;  %642 = vmatpush3.bf16.msra.mxu1 %v641_v51 }
  0x16   : > { %643 = vmatprep.subr.bf16.mxu1 %v764_v34  ;;  %s768_s13 = smov [#allocation2]  }
  0x17   : > { %s562_s22 = sshll.u32 %s135_s21, 3  ;;  %s702_s4 = sshll.u32 %s768_s13, 4  ;;  %s703_s4 = int_to_ptr.vmem [resolvable:$false] %s702_s4 }
  0x18   : > { %s137_s25 = scalar_lea.vmem %s927_s0, %s562_s22  ;;  %s704_s5 = scalar_lea.vmem %s703_s4, 32 }
  0x19   : > { %v138_v7 = vld [vmem:[%s137_s25] sm:$0x7f]  ;;  %645 = vmatpush3.bf16.msra.mxu1 %v644_v54  ;;  %s133_s25 = scalar_lea.vmem [#allocation2], %s132_s23 }
  0x1a   : > { %v649_v8 = vtrunc.f32 %v138_v7  ;;  %v227_v11 = vmul.f32 0.125, %v138_v7  ;;  %646 = vmatprep.subr.bf16.mxu1 %v764_v34  ;;  %s503_s26 = sshll.u32 %s133_s25, 4  ;;  %s887_s26 = int_to_ptr.vmem [resolvable:$true] %s503_s26 }
  0x1b   : > { %s698_s3 = scalar_lea.vmem %s887_s26, 16  ;;  %p705_p0 = scmp.lt.s32.totalorder %s887_s26, %s703_s4 }
  0x1c   : > { %v650_v12 = vcvt.f32.s32 %v649_v8  ;;  %v236_v13 = vrot.slane %v227_v11, %v235_v6  ;;  %v229_v14 = vcombine.high %v227_v11, %v227_v11  ;;  %p699_p11 = scmp.ne.s32.totalorder %s887_s26, %s698_s3  ;;  %p706_p1 = scmp.lt.s32.totalorder %s704_s5, %s698_s3 }
  0x1d   : > { %648 = vmatpush3.bf16.msra.mxu1 %v647_v57 }
  0x1e   : > { %v161_v15 = vrot.slane %v650_v12, %v160_v9  ;;  %v153_v16 = vrot.slane %v650_v12, %v152_v10  ;;  %v252_v17 = vrot.slane %v236_v13, %v235_v6  ;;  %v244_v18 = vcombine.high %v236_v13, %v236_v13  ;;  %p700_p12 = pnand %p699_p11, %p822_p5  ;;  %p707_p2 = por %p706_p1, %p705_p0 }
  0x1f   : > { %v243_v19 = vrot.slane %v229_v14, %v235_v6  ;;  %v169_v32 = vrot.slane %v650_v12, %v168_v29  ;;  %v177_v37 = vrot.slane %v650_v12, %v176_v30  ;;  %v185_v39 = vrot.slane %v650_v12, %v184_v36 }
  0x20   : > { %164 = vbcast.lane.b32.xlu1 %v161_v15, 257  ;;  %156 = vbcast.lane.b32.xlu0 %v153_v16, 257  ;;  %v274_v20 = vcombine.high %v252_v17, %v252_v17  ;;  %v280_v21 = vrot.slane %v252_v17, %v152_v10  ;;  %v266_v22 = vrot.slane %v244_v18, %v235_v6  ;;  %p701_p13 = pneg %p700_p12 }
  0x21   : > { %v245_v23 = vcombine.high %v243_v19, %v243_v19  ;;  %v259_v33 = vrot.slane %v243_v19, %v235_v6  ;;  %v193_v41 = vrot.slane %v650_v12, %v192_v38  ;;  %v201_v44 = vrot.slane %v650_v12, %v200_v42 }
  0x22   : > { %v288_v24 = vrot.slane %v274_v20, %v152_v10  ;;  %v276_v25 = vcombine.high %v266_v22, %v266_v22  ;;  %v284_v27 = vrot.slane %v266_v22, %v152_v10  ;;  %p708_p3 = pnand %p707_p2, %p701_p13 }
  0x23   : > { %v273_v28 = vrot.slane %v245_v23, %v235_v6  ;;  %v296_v35 = vrot.slane %v259_v33, %v152_v10  ;;  %v275_v40 = vcombine.high %v259_v33, %v259_v33 }
  0x24   : > { %314 = vperm.xlu1 %697, %v288_v24   ;;  %306 = vperm.xlu0 %696, %v280_v21   ;;  %v292_v26 = vrot.slane %v276_v25, %v152_v10 }
  0x25   : > { %v300_v31 = vrot.slane %v273_v28, %v152_v10  ;;  %v304_v43 = vrot.slane %v275_v40, %v152_v10 }
  0x28   : > { %318 = vperm.xlu1 %697, %v292_v26   ;;  %310 = vperm.xlu0 %696, %v284_v27   ;;  %v767_v26 = vmov 1.0  }
  0x2c   : > { %326 = vperm.xlu1 %697, %v300_v31   ;;  %172 = vbcast.lane.b32.xlu0 %v169_v32, 257 }
  0x30   : > { %322 = vperm.xlu0 %696, %v296_v35   ;;  %180 = vbcast.lane.b32.xlu1 %v177_v37, 257 }
  0x34   : > { %188 = vbcast.lane.b32.xlu0 %v185_v39, 257  ;;  %196 = vbcast.lane.b32.xlu1 %v193_v41, 257 }
  0x38   : > { %330 = vperm.xlu0 %696, %v304_v43   ;;  %204 = vbcast.lane.b32.xlu1 %v201_v44, 257 }
  0x92   : > { %v165_v58 = vpop.permute.xlu1 %164  ;;  %v157_v59 = vpop.permute.xlu0 %156 }
  0x93   : > { %vm207_vm1 = vcmp.eq.s32.totalorder %v165_v58, %v149_v60  ;;  %vm206_vm2 = vcmp.eq.s32.totalorder %v157_v59, %v149_v60 }
  0x94   : > { %v563_v63 = vsel %vm206_vm2, 1.0, %v766_v45  ;;  %v564_v2 = vsel %vm207_vm1, 1.0, %v766_v45 }
  0xa3   : > { %v315_v61 = vpop.permute.xlu1 %314  ;;  %v307_v62 = vpop.permute.xlu0 %306 }
  0xa4   : > { %v333_v4 = vmul.f32 %v563_v63, %v307_v62 }
  0xa7   : > { %v319_v1 = vpop.permute.xlu1 %318  ;;  %v311_v3 = vpop.permute.xlu0 %310 }
  0xa8   : > { %v334_v5 = vmul.f32 %v564_v2, %v311_v3 }
  0xaa   : > { %v629_v6 = vpack.c.bf16 %v334_v5, %v333_v4 }
  0xab   : > { %v327_v7 = vpop.permute.xlu1 %326  ;;  %v173_v8 = vpop.permute.xlu0 %172 }
  0xac   : > { %vm208_vm3 = vcmp.eq.s32.totalorder %v173_v8, %v149_v60  ;;  %630 = vmatpush3.bf16.msra.mxu0 %v629_v6 }
  0xad   : > { %631 = vmatprep.subr.bf16.mxu0 %v764_v34  ;;  %v565_v0 = vsel %vm208_vm3, 1.0, %v766_v45 }
  0xae   : > { %v335_v12 = vmul.f32 %v565_v0, %v315_v61 }
  0xaf   : > { %v181_v9 = vpop.permute.xlu1 %180  ;;  %v323_v10 = vpop.permute.xlu0 %322 }
  0xb0   : > { %vm209_vm4 = vcmp.eq.s32.totalorder %v181_v9, %v149_v60 }
  0xb1   : > { %v566_v11 = vsel %vm209_vm4, 1.0, %v766_v45 }
  0xb2   : > { %v336_v13 = vmul.f32 %v566_v11, %v319_v1 }
  0xb3   : > { %v197_v14 = vpop.permute.xlu1 %196  ;;  %v189_v15 = vpop.permute.xlu0 %188 }
  0xb4   : > { %vm211_vm5 = vcmp.eq.s32.totalorder %v197_v14, %v149_v60  ;;  %vm210_vm6 = vcmp.eq.s32.totalorder %v189_v15, %v149_v60  ;;  %v632_v16 = vpack.c.bf16 %v336_v13, %v335_v12 }
  0xb5   : > { %v568_v17 = vsel %vm211_vm5, 1.0, %v766_v45  ;;  %v567_v18 = vsel %vm210_vm6, 1.0, %v766_v45 }
  0xb6   : > { %v338_v19 = vmul.f32 %v568_v17, %v327_v7  ;;  %v337_v20 = vmul.f32 %v567_v18, %v323_v10  ;;  %633 = vmatpush3.bf16.msra.mxu0 %v632_v16 }
  0xb7   : > { %v205_v21 = vpop.permute.xlu1 %204  ;;  %634 = vmatprep.subr.bf16.mxu0 %v764_v34  ;;  %v331_v24 = vpop.permute.xlu0 %330 }
  0xb8   : > { %vm212_vm7 = vcmp.eq.s32.totalorder %v205_v21, %v149_v60  ;;  %v635_v22 = vpack.c.bf16 %v338_v19, %v337_v20 }
  0xb9   : > { %v569_v23 = vsel %vm212_vm7, 1.0, %v766_v45 }
  0xba   : > { %636 = vmatpush3.bf16.msra.mxu0 %v635_v22  ;;  %v339_v25 = vmul.f32 %v569_v23, %v331_v24 }
  0xbb   : > { %604 = vmatprep.subr.mxu0 %v766_v45 }
  0xbe   : > { %605 = vmatpush3.msra.mxu0 %v339_v25 }
  0xbf   : > { %607 = vmatmul.mubr.msk.f32.vlgmr.msra.gmra.mrb[0].mxu0 %vm340_vm8, %v767_v26 }
 0x192   : > { %v410_v27 = vpop.f32.mrb[0].mxu0 }
 0x193   : > { %v608_v28 = vpop.f32.mrb[1].mxu0  ;;  %626 = vmatmul.mubr.msk.f32.vlgmr.msra.gmra.mrb[0].mxu1 %vm414_vm9, %v410_v27 }
 0x266   : > { %v484_v29 = vpop.f32.mrb[0].mxu1 }
 0x267   : > { %489 = vst.msk [vmem:[%s133_s25] sm:$0x1] %vm488_vm10, %v484_v29  ;;  %v627_v30 = vpop.f32.mrb[1].mxu1 }
 0x268   : > { %711 = shalt.err (!%p708_p3)
}
 0x269   : > { %s712_s6 = scalar_lea.hbm %s885_s29, 16  ;;  %s716_s14 = scalar_lea.hbm %s929_s2, 64 }
 0x26a   : > { %p713_p4 = scmp.ne.s32.totalorder %s885_s29, %s712_s6  ;;  %p717_p9 = scmp.lt.u32.totalorder %s885_s29, %s929_s2 }
 0x26b   : > { %p718_p10 = scmp.lt.u32.totalorder %s716_s14, %s712_s6  ;;  %p720_p12 = scmp.lt.u32.totalorder %s712_s6, %s885_s29 }
 0x26c   : > { %p714_p7 = pnand %p713_p4, %p822_p5 }
 0x26d   : > { %p719_p11 = por %p718_p10, %p717_p9 }
 0x26e   : > { %p715_p8 = pneg %p714_p7 }
 0x26f   : > { %p721_p13 = por %p720_p12, %p719_p11 }
 0x271   : > { %p722_p0 = pnand %p721_p13, %p715_p8 }
 0x273   : > { %725 = shalt.err (!%p722_p0)
}
 0x274   : > { %651 = dma.vmem_to_hbm [thread:$0]  (%p822_p5), %s887_s26, 16, %s885_s29, %s491_s30  }
 0x275 PF: > { %p657_p1 = scmp.ge.s32.totalorder %s760_s12, 2  ;;  %s515_s21 = sand.u32 1, %s748_s9  }
 0x276   : > { %s516_s22 = scalar_lea.sflag [#allocation3], %s515_s21 }
 0x277   : > { %p654_p2 = pnand %p657_p1, %p826_p6 }
 0x279   : > { %743 = dma.done.wait (!%p654_p2), %s516_s22, 16  }
 0x27a   : > { %745 = vsyncadd (!%p654_p2), %s516_s22, 4294967280  ;;  %p12_p3 = scmp.ge.s32.totalorder %s809_s15, 6   ;;  %s932_s9 = smov %s752_s10 }
 0x27b   : > { %s933_s10 = smov %s756_s11  ;;  %s934_s11 = smov %s820_s18 }
 0x27c   : > { %s935_s12 = smov %s809_s15  ;;  %14 = sbr.rel (!%p12_p3) target bundleno = 3 (0x3), region = 63 }
 0x283   :  { %520 = vsyncpa [#allocation3], 1 }
 0x284   :  { %522 = vsyncpa [#allocation3 + $0x1], 1 }

</bundles_post_ra>
